<compile_context>
chip_gen: v6e
topology: v6e:2x2x1
jax: 0.10.0
libtpu: 0.0.40
codegen_flags: <defaults>
</compile_context>

<pallas_src>
import functools

import jax
import jax.numpy as jnp
import numpy as np
from jax.experimental import pallas as pl
from jax.experimental.pallas import tpu as pltpu


def _round_up(x, m):
    return (x + m - 1) // m * m


_LANE_TARGET = 2048                     # per-step lane-block sweet spot (1-4K lanes)
_VMEM_CAP_BYTES = 48 * 1024 * 1024      # conservative per-step budget (v7x: 64 MiB physical)


# ----------------------------- Pallas kernels ------------------------------- #
def _conv3(w, v, nf, nl, c_contr, three_dots, length, prec):
    """3-tap conv (kernel=3, pad=1) of v:(C, L) with tap-stacked weights w:(C_out, 3*C)."""
    prev = pltpu.roll(v, shift=1, axis=1) * nf            # x[t-1], masked at t == 0
    nxt = pltpu.roll(v, shift=length - 1, axis=1) * nl    # x[t+1], masked at t == T-1
    if three_dots:
        # Three accumulating MXU dots: no (3C, L) concat temp in VMEM (saves vst traffic;
        # accumulation lands in the MRB on v7x).
        acc = jnp.dot(w[:, c_contr:2 * c_contr], v,
                      preferred_element_type=jnp.float32, precision=prec)
        acc = acc + jnp.dot(w[:, :c_contr], prev,
                            preferred_element_type=jnp.float32, precision=prec)
        acc = acc + jnp.dot(w[:, 2 * c_contr:], nxt,
                            preferred_element_type=jnp.float32, precision=prec)
        return acc
    # Small C: a single MXU matmul over the tap-stacked contraction keeps the MXU K-fill high.
    stacked = jnp.concatenate([prev, v, nxt], axis=0)
    return jnp.dot(w, stacked, preferred_element_type=jnp.float32, precision=prec)


def _resblock_body(x_ref, w1_ref, b1_ref, w2_ref, b2d_ref, o_ref, wd_ref, *,
                   seq_len, c_in_p, c_out_p, three_dots):
    length = o_ref.shape[1]
    x = x_ref[...]
    prec = jax.lax.Precision.HIGHEST if x.dtype == jnp.float32 else None

    # Position of each lane inside its length-`seq_len` sequence (batch elements packed
    # back-to-back along lanes).  Padded tail lanes produce garbage that the wrapper slices off.
    t = jax.lax.broadcasted_iota(jnp.int32, (1, length), 1) % seq_len
    nf = (t != 0).astype(x.dtype)              # kills the t-1 tap at t == 0
    nl = (t != seq_len - 1).astype(x.dtype)    # kills the t+1 tap at t == T-1

    # conv1 (k=3, pad=1) + folded bn1 + relu
    h = _conv3(w1_ref[...], x, nf, nl, c_in_p, three_dots, length, prec)
    h = jnp.maximum(h + b1_ref[...], 0.0).astype(x.dtype)

    # conv2 (k=3, pad=1) + folded bn2
    out = _conv3(w2_ref[...], h, nf, nl, c_out_p, three_dots, length, prec)

    # shortcut branch
    if wd_ref is None:
        idn = x.astype(jnp.float32)            # identity shortcut: no 1x1 matmul needed
    else:
        idn = jnp.dot(wd_ref[...], x, preferred_element_type=jnp.float32, precision=prec)

    # residual add (merged bn2 + downsample-bn bias) + relu
    o_ref[...] = jnp.maximum(out + idn + b2d_ref[...], 0.0).astype(o_ref.dtype)


def resblock1d_kernel_ds(x_ref, w1_ref, b1_ref, w2_ref, wd_ref, b2d_ref, o_ref, **kw):
    _resblock_body(x_ref, w1_ref, b1_ref, w2_ref, b2d_ref, o_ref, wd_ref, **kw)


def resblock1d_kernel_id(x_ref, w1_ref, b1_ref, w2_ref, b2d_ref, o_ref, **kw):
    _resblock_body(x_ref, w1_ref, b1_ref, w2_ref, b2d_ref, o_ref, None, **kw)


# ------------------------------- wrapper ------------------------------------ #
def _plan_lanes(batch, seq_len, c_in_p, c_out_p, in_dsize):
    """Pick (block_lanes, n_blocks, lanes_total, per_step_vmem_bytes) for the (C, B*T) slab."""
    total = batch * seq_len
    unit = int(np.lcm(seq_len, 128))   # smallest whole-sequence block that is lane-aligned

    def vmem_bytes(lb):
        io = 2 * (c_in_p * in_dsize + c_out_p * 4) * lb        # double-buffered in/out blocks
        tmp = (3 * c_in_p + 5 * c_out_p) * 4 * lb              # taps + h + f32 accumulators
        return io + tmp

    if unit <= _LANE_TARGET and total >= 2 * unit:
        # Multi-block grid: each block holds whole sequences; aim for ~_LANE_TARGET lanes and
        # always >= 2 blocks so the "parallel" axis can shard across v7x's two TensorCores.
        k = max(1, min(_LANE_TARGET, total // 2) // unit)
        while k > 1 and vmem_bytes(k * unit) > _VMEM_CAP_BYTES:
            k -= 1
        lb = k * unit
        lanes_total = _round_up(total, lb)
        return lb, lanes_total // lb, lanes_total, vmem_bytes(lb)

    # Small batch (or awkward T where lcm(T,128) would blow the lane budget): one block over all
    # lanes, padded only to the next multiple of 128 — no whole-sequence padding waste.
    # TODO(synk): time-tile with 1-sample halos when this single block exceeds the VMEM cap.
    lb = _round_up(max(total, 1), 128)
    return lb, 1, lb, vmem_bytes(lb)


def _fold_bn(gamma, beta, mean, var, eps=1e-5):
    scale = gamma.astype(jnp.float32) / jnp.sqrt(var.astype(jnp.float32) + eps)
    bias = beta.astype(jnp.float32) - mean.astype(jnp.float32) * scale
    return scale, bias


def _stack_conv_weight(w, scale, cin_p, cout_p, dtype):
    # w: (C_out, C_in, 3) -> (C_out_p, 3*C_in_p); per-output-channel BN scale folded in.
    # Contraction layout [tap0 | tap1 | tap2] matches the [x(t-1); x(t); x(t+1)] stacking.
    w = w.astype(jnp.float32) * scale[:, None, None]
    w = jnp.transpose(w, (2, 0, 1))                                    # (3, C_out, C_in)
    w = jnp.pad(w, ((0, 0), (0, cout_p - w.shape[1]), (0, cin_p - w.shape[2])))
    return jnp.transpose(w, (1, 0, 2)).reshape(cout_p, 3 * cin_p).astype(dtype)


def resblock1d_slab(x_slab, params, *, batch, seq_len, compute_dtype=jnp.float32,
                    three_dots=None, out_dtype=jnp.float32):
    """ResBlock1D on a lane-dense slab.

    x_slab: (C_in_p, lanes_total) — channels on sublanes, batch*time packed along lanes,
    padded rows/lanes zero.  Chain consecutive ResBlock1D layers in this layout and only
    convert at network boundaries to avoid per-layer transpose HBM passes.
    """
    c_out, c_in = params["w1"].shape[0], params["w1"].shape[1]
    in_dsize = jnp.dtype(compute_dtype).itemsize
    sub = 8 if in_dsize == 4 else 16            # sublane granularity (f32: 8, bf16: 16)
    c_in_p = _round_up(c_in, sub)
    c_out_p = _round_up(c_out, sub)
    assert x_slab.shape[0] == c_in_p, (x_slab.shape, c_in_p)

    lb, n_blocks, lanes_total, step_bytes = _plan_lanes(batch, seq_len, c_in_p, c_out_p, in_dsize)
    assert x_slab.shape[1] == lanes_total, (x_slab.shape, lanes_total)

    has_ds = params["wd"] is not None
    if three_dots is None:
        # Tap-stacked single dot for small C (MXU contraction fill); three accumulating
        # dots for large C (skips the (3C, L) concat temp / extra vst traffic).
        three_dots = max(c_in_p, c_out_p) >= 128

    # Fold eval-mode BatchNorm into conv / downsample weights; merge trailing biases.
    s1, b1 = _fold_bn(params["g1"], params["b1"], params["m1"], params["v1"])
    s2, b2 = _fold_bn(params["g2"], params["b2"], params["m2"], params["v2"])
    w1s = _stack_conv_weight(params["w1"], s1, c_in_p, c_out_p, compute_dtype)
    w2s = _stack_conv_weight(params["w2"], s2, c_out_p, c_out_p, compute_dtype)
    b1_col = jnp.pad(b1, (0, c_out_p - c_out)).reshape(c_out_p, 1)

    if has_ds:
        sd, bd = _fold_bn(params["gd"], params["bd"], params["md"], params["vd"])
        wd = jnp.pad(params["wd"].astype(jnp.float32) * sd[:, None],
                     ((0, c_out_p - c_out), (0, c_in_p - c_in))).astype(compute_dtype)
        b2d = b2 + bd
    else:
        assert c_in == c_out, "identity shortcut requires in_ch == out_ch"
        b2d = b2
    b2d_col = jnp.pad(b2d, (0, c_out_p - c_out)).reshape(c_out_p, 1)

    x_slab = x_slab.astype(compute_dtype)

    kern_kw = dict(seq_len=seq_len, c_in_p=c_in_p, c_out_p=c_out_p, three_dots=three_dots)
    in_specs = [
        pl.BlockSpec((c_in_p, lb), lambda i: (0, i)),               # x slab (lane-dense)
        pl.BlockSpec((c_out_p, 3 * c_in_p), lambda i: (0, 0)),      # w1 (tap-stacked)
        pl.BlockSpec((c_out_p, 1), lambda i: (0, 0)),               # folded bn1 bias
        pl.BlockSpec((c_out_p, 3 * c_out_p), lambda i: (0, 0)),     # w2 (tap-stacked)
    ]
    args = [x_slab, w1s, b1_col, w2s]
    if has_ds:
        kernel = functools.partial(resblock1d_kernel_ds, **kern_kw)
        in_specs.append(pl.BlockSpec((c_out_p, c_in_p), lambda i: (0, 0)))   # 1x1 downsample
        args.append(wd)
    else:
        kernel = functools.partial(resblock1d_kernel_id, **kern_kw)
    in_specs.append(pl.BlockSpec((c_out_p, 1), lambda i: (0, 0)))            # merged bias
    args.append(b2d_col)

    flops = 2 * lanes_total * (3 * c_in_p * c_out_p + 3 * c_out_p * c_out_p
                               + (c_in_p * c_out_p if has_ds else 0))
    bytes_accessed = (c_in_p * lanes_total * in_dsize
                      + c_out_p * lanes_total * jnp.dtype(out_dtype).itemsize
                      + (w1s.size + w2s.size) * in_dsize)
    vmem_limit = int(min(max(2 * step_bytes, 32 * 1024 * 1024), 56 * 1024 * 1024))

    return pl.pallas_call(
        kernel,
        out_shape=jax.ShapeDtypeStruct((c_out_p, lanes_total), out_dtype),
        grid_spec=pltpu.PrefetchScalarGridSpec(
            num_scalar_prefetch=0,
            grid=(n_blocks,),
            in_specs=in_specs,
            out_specs=pl.BlockSpec((c_out_p, lb), lambda i: (0, i)),
        ),
        compiler_params=pltpu.CompilerParams(
            dimension_semantics=("parallel",),
            vmem_limit_bytes=vmem_limit,
        ),
        cost_estimate=pl.CostEstimate(flops=int(flops), transcendentals=0,
                                      bytes_accessed=int(bytes_accessed)),
    )(*args)


@functools.partial(jax.jit, static_argnames=("compute_dtype", "three_dots"))
def resblock1d_pallas(x, params, compute_dtype=jnp.float32, three_dots=None):
    """(B, C_in, T) -> (B, C_out, T).  Standalone entry point with layout conversion.

    TODO(synk): for stacks of ResBlock1D layers, keep activations in slab layout and call
    resblock1d_slab per layer instead — it avoids the per-layer transpose HBM passes here.
    """
    B, C_in, T = x.shape
    C_out = params["w1"].shape[0]
    in_dsize = jnp.dtype(compute_dtype).itemsize
    sub = 8 if in_dsize == 4 else 16
    c_in_p = _round_up(C_in, sub)
    c_out_p = _round_up(C_out, sub)
    _, _, lanes_total, _ = _plan_lanes(B, T, c_in_p, c_out_p, in_dsize)

    # (B, C_in, T) -> (C_in_p, lanes_total) lane-dense slab (no whole-sequence padding).
    xs = jnp.transpose(x, (1, 0, 2)).reshape(C_in, B * T)
    xs = jnp.pad(xs, ((0, c_in_p - C_in), (0, lanes_total - B * T))).astype(compute_dtype)

    out_slab = resblock1d_slab(xs, params, batch=B, seq_len=T,
                               compute_dtype=compute_dtype, three_dots=three_dots)
    out = out_slab[:C_out, :B * T].reshape(C_out, B, T)
    return jnp.transpose(out, (1, 0, 2)).astype(jnp.float32)


# --------------------------- pure-JAX reference ----------------------------- #
def resblock1d_reference(x, p, eps=1e-5):
    dn = ("NCH", "OIH", "NCH")
    prec = jax.lax.Precision.HIGHEST

    def conv(x_, w, pad):
        return jax.lax.conv_general_dilated(x_, w, (1,), [(pad, pad)],
                                            dimension_numbers=dn, precision=prec)

    def bn(x_, g, b, m, v):
        g, b, m, v = (a[None, :, None] for a in (g, b, m, v))
        return (x_ - m) / jnp.sqrt(v + eps) * g + b

    out = conv(x, p["w1"], 1)
    out = jax.nn.relu(bn(out, p["g1"], p["b1"], p["m1"], p["v1"]))
    out = bn(conv(out, p["w2"], 1), p["g2"], p["b2"], p["m2"], p["v2"])
    if p["wd"] is None:
        idn = x
    else:
        idn = bn(conv(x, p["wd"][:, :, None], 0), p["gd"], p["bd"], p["md"], p["vd"])
    return jax.nn.relu(out + idn)


# --------------------------------- main -------------------------------------- #
def make_params(key, in_ch, out_ch):
    ks = jax.random.split(key, 12)
    p = {
        "w1": jax.random.normal(ks[0], (out_ch, in_ch, 3), jnp.float32) * 0.2,
        "g1": 1.0 + 0.1 * jax.random.normal(ks[1], (out_ch,), jnp.float32),
        "b1": 0.1 * jax.random.normal(ks[2], (out_ch,), jnp.float32),
        "m1": 0.1 * jax.random.normal(ks[3], (out_ch,), jnp.float32),
        "v1": jax.random.uniform(ks[4], (out_ch,), jnp.float32, 0.5, 1.5),
        "w2": jax.random.normal(ks[5], (out_ch, out_ch, 3), jnp.float32) * 0.2,
        "g2": 1.0 + 0.1 * jax.random.normal(ks[6], (out_ch,), jnp.float32),
        "b2": 0.1 * jax.random.normal(ks[7], (out_ch,), jnp.float32),
        "m2": 0.1 * jax.random.normal(ks[8], (out_ch,), jnp.float32),
        "v2": jax.random.uniform(ks[9], (out_ch,), jnp.float32, 0.5, 1.5),
    }
    if in_ch != out_ch:
        kd = jax.random.split(ks[10], 5)
        p.update({
            "wd": jax.random.normal(kd[0], (out_ch, in_ch), jnp.float32) * 0.2,
            "gd": 1.0 + 0.1 * jax.random.normal(kd[1], (out_ch,), jnp.float32),
            "bd": 0.1 * jax.random.normal(kd[2], (out_ch,), jnp.float32),
            "md": 0.1 * jax.random.normal(kd[3], (out_ch,), jnp.float32),
            "vd": jax.random.uniform(kd[4], (out_ch,), jnp.float32, 0.5, 1.5),
        })
    else:
        p.update({"wd": None, "gd": None, "bd": None, "md": None, "vd": None})
    return p


if __name__ == "__main__":
    key = jax.random.PRNGKey(0)
    kx, kp, kp2, kx2, kp3 = jax.random.split(key, 5)

    # Case 1: downsample path (in_ch != out_ch), small batch -> single 128-lane block.
    B, C_IN, C_OUT, T = 2, 4, 8, 16
    x = jax.random.normal(kx, (B, C_IN, T), jnp.float32)
    params = make_params(kp, C_IN, C_OUT)
    ref = np.asarray(resblock1d_reference(x, params))

    out = jax.block_until_ready(resblock1d_pallas(x, params))
    np.testing.assert_allclose(np.asarray(out), ref, rtol=1e-3, atol=1e-3)

    # Case 1b: same inputs through the three-accumulating-dots conv path (used for large C).
    out3 = jax.block_until_ready(resblock1d_pallas(x, params, three_dots=True))
    np.testing.assert_allclose(np.asarray(out3), ref, rtol=1e-3, atol=1e-3)

    # Case 1c: bf16 MXU operands / f32 accumulation (v6e/v7x peak MXU path).
    outb = jax.block_until_ready(resblock1d_pallas(x, params, compute_dtype=jnp.bfloat16))
    np.testing.assert_allclose(np.asarray(outb), ref, rtol=1e-1, atol=1e-1)

    # Case 2: identity shortcut (in_ch == out_ch) -> kernel with no downsample matmul.
    params_id = make_params(kp2, C_OUT, C_OUT)
    x_id = jax.random.normal(kx2, (B, C_OUT, T), jnp.float32)
    out_id = jax.block_until_ready(resblock1d_pallas(x_id, params_id))
    np.testing.assert_allclose(np.asarray(out_id),
                               np.asarray(resblock1d_reference(x_id, params_id)),
                               rtol=1e-3, atol=1e-3)

    # Case 3: multi-block grid (whole sequences per block, >= 2 blocks -> megacore-shardable).
    Bm, Cm_in, Cm_out, Tm = 32, 8, 16, 128
    xm = jax.random.normal(kx, (Bm, Cm_in, Tm), jnp.float32)
    params_m = make_params(kp3, Cm_in, Cm_out)
    out_m = jax.block_until_ready(resblock1d_pallas(xm, params_m))
    np.testing.assert_allclose(np.asarray(out_m),
                               np.asarray(resblock1d_reference(xm, params_m)),
                               rtol=1e-3, atol=1e-3)

    print("KERNEL_OK")
</pallas_src>

<mosaic_0001>
module attributes {stable_mosaic.version = 11 : i64} {
  func.func @resblock1d_kernel_ds(%arg0: i32, %arg1: memref<8x128xf32, #tpu.memory_space<vmem>>, %arg2: memref<8x24xf32, #tpu.memory_space<vmem>>, %arg3: memref<8x1xf32, #tpu.memory_space<vmem>>, %arg4: memref<8x24xf32, #tpu.memory_space<vmem>>, %arg5: memref<8x8xf32, #tpu.memory_space<vmem>>, %arg6: memref<8x1xf32, #tpu.memory_space<vmem>>, %arg7: memref<8x128xf32, #tpu.memory_space<vmem>>) attributes {dimension_semantics = [#tpu.dimension_semantics<parallel>], iteration_bounds = array<i64: 1>, scalar_prefetch = 0 : i64, scratch_operands = 0 : i64, tpu.core_type = #tpu.core_type<tc>, window_params = [{transform_indices = @transform_0, window_bounds = array<i64: 8, 128>}, {pipeline_mode = #tpu.pipeline_mode<synchronous>, transform_indices = @transform_1, window_bounds = array<i64: 8, 24>}, {pipeline_mode = #tpu.pipeline_mode<synchronous>, transform_indices = @transform_2, window_bounds = array<i64: 8, 1>}, {pipeline_mode = #tpu.pipeline_mode<synchronous>, transform_indices = @transform_3, window_bounds = array<i64: 8, 24>}, {pipeline_mode = #tpu.pipeline_mode<synchronous>, transform_indices = @transform_4, window_bounds = array<i64: 8, 8>}, {pipeline_mode = #tpu.pipeline_mode<synchronous>, transform_indices = @transform_5, window_bounds = array<i64: 8, 1>}, {transform_indices = @transform_6, window_bounds = array<i64: 8, 128>}]} {
    %c0 = arith.constant 0 : index
    %c0_0 = arith.constant 0 : index
    %0 = vector.load %arg1[%c0, %c0_0] : memref<8x128xf32, #tpu.memory_space<vmem>>, vector<8x128xf32>
    %1 = tpu.iota {dimensions = array<i32: 1>} : vector<1x128xi32>
    %c16_i32 = arith.constant 16 : i32
    %c0_i32 = arith.constant 0 : i32
    %2 = arith.cmpi eq, %c16_i32, %c0_i32 : i32
    %c1_i32 = arith.constant 1 : i32
    %3 = arith.select %2, %c1_i32, %c16_i32 : i32
    %4 = vector.broadcast %3 : i32 to vector<1x128xi32>
    %5 = arith.remsi %1, %4 : vector<1x128xi32>
    %c0_i32_1 = arith.constant 0 : i32
    %6 = vector.broadcast %c0_i32_1 : i32 to vector<1x128xi32>
    %7 = arith.cmpi ne, %5, %6 : vector<1x128xi32>
    %c0_i32_2 = arith.constant 0 : i32
    %8 = vector.broadcast %c0_i32_2 : i32 to vector<1x128xi32>
    %9 = arith.cmpi slt, %5, %8 : vector<1x128xi32>
    %c0_i32_3 = arith.constant 0 : i32
    %10 = arith.cmpi slt, %3, %c0_i32_3 : i32
    %11 = vector.broadcast %10 : i1 to vector<1x128xi1>
    %12 = vector.broadcast %11 : vector<1x128xi1> to vector<1x128xi1>
    %13 = arith.xori %9, %12 : vector<1x128xi1>
    %14 = arith.andi %13, %7 : vector<1x128xi1>
    %15 = vector.broadcast %3 : i32 to vector<1x128xi32>
    %16 = arith.addi %5, %15 : vector<1x128xi32>
    %17 = arith.select %14, %16, %5 : vector<1x128xi1>, vector<1x128xi32>
    %c0_i32_4 = arith.constant 0 : i32
    %18 = vector.broadcast %c0_i32_4 : i32 to vector<1x128xi32>
    %19 = arith.cmpi ne, %17, %18 : vector<1x128xi32>
    %20 = arith.extui %19 : vector<1x128xi1> to vector<1x128xi32>
    %21 = arith.sitofp %20 : vector<1x128xi32> to vector<1x128xf32>
    %c15_i32 = arith.constant 15 : i32
    %22 = vector.broadcast %c15_i32 : i32 to vector<1x128xi32>
    %23 = arith.cmpi ne, %17, %22 : vector<1x128xi32>
    %24 = arith.extui %23 : vector<1x128xi1> to vector<1x128xi32>
    %25 = arith.sitofp %24 : vector<1x128xi32> to vector<1x128xf32>
    %c0_5 = arith.constant 0 : index
    %c0_6 = arith.constant 0 : index
    %26 = vector.load %arg2[%c0_5, %c0_6] : memref<8x24xf32, #tpu.memory_space<vmem>>, vector<8x24xf32>
    %c1_i32_7 = arith.constant 1 : i32
    %27 = tpu.dynamic_rotate %0 by %c1_i32_7 dim 1 : vector<8x128xf32>, i32 -> vector<8x128xf32>
    %28 = vector.broadcast %21 : vector<1x128xf32> to vector<8x128xf32>
    %29 = arith.mulf %27, %28 : vector<8x128xf32>
    %c127_i32 = arith.constant 127 : i32
    %30 = tpu.dynamic_rotate %0 by %c127_i32 dim 1 : vector<8x128xf32>, i32 -> vector<8x128xf32>
    %31 = vector.broadcast %25 : vector<1x128xf32> to vector<8x128xf32>
    %32 = arith.mulf %30, %31 : vector<8x128xf32>
    %33 = tpu.concatenate %29, %0, %32 in 0 : vector<8x128xf32>, vector<8x128xf32>, vector<8x128xf32> -> vector<24x128xf32>
    %cst = arith.constant dense<0.000000e+00> : vector<8x128xf32>
    %34 = tpu.matmul %26, %33, %cst {dimension_numbers = #tpu.dot_dimension_numbers<[1], [0], [0], [1], [0, 0, 1, 1], [], []>, precision = #tpu.contract_precision<fp32>} : vector<8x24xf32>, vector<24x128xf32>, vector<8x128xf32> -> vector<8x128xf32>
    %c0_8 = arith.constant 0 : index
    %c0_9 = arith.constant 0 : index
    %35 = vector.load %arg3[%c0_8, %c0_9] : memref<8x1xf32, #tpu.memory_space<vmem>>, vector<8x1xf32>
    %36 = vector.broadcast %35 : vector<8x1xf32> to vector<8x128xf32>
    %37 = arith.addf %34, %36 : vector<8x128xf32>
    %cst_10 = arith.constant 0.000000e+00 : f32
    %38 = vector.broadcast %cst_10 : f32 to vector<8x128xf32>
    %39 = arith.maximumf %37, %38 : vector<8x128xf32>
    %c0_11 = arith.constant 0 : index
    %c0_12 = arith.constant 0 : index
    %40 = vector.load %arg4[%c0_11, %c0_12] : memref<8x24xf32, #tpu.memory_space<vmem>>, vector<8x24xf32>
    %c1_i32_13 = arith.constant 1 : i32
    %41 = tpu.dynamic_rotate %39 by %c1_i32_13 dim 1 : vector<8x128xf32>, i32 -> vector<8x128xf32>
    %42 = vector.broadcast %21 : vector<1x128xf32> to vector<8x128xf32>
    %43 = arith.mulf %41, %42 : vector<8x128xf32>
    %c127_i32_14 = arith.constant 127 : i32
    %44 = tpu.dynamic_rotate %39 by %c127_i32_14 dim 1 : vector<8x128xf32>, i32 -> vector<8x128xf32>
    %45 = vector.broadcast %25 : vector<1x128xf32> to vector<8x128xf32>
    %46 = arith.mulf %44, %45 : vector<8x128xf32>
    %47 = tpu.concatenate %43, %39, %46 in 0 : vector<8x128xf32>, vector<8x128xf32>, vector<8x128xf32> -> vector<24x128xf32>
    %cst_15 = arith.constant dense<0.000000e+00> : vector<8x128xf32>
    %48 = tpu.matmul %40, %47, %cst_15 {dimension_numbers = #tpu.dot_dimension_numbers<[1], [0], [0], [1], [0, 0, 1, 1], [], []>, precision = #tpu.contract_precision<fp32>} : vector<8x24xf32>, vector<24x128xf32>, vector<8x128xf32> -> vector<8x128xf32>
    %c0_16 = arith.constant 0 : index
    %c0_17 = arith.constant 0 : index
    %49 = vector.load %arg5[%c0_16, %c0_17] : memref<8x8xf32, #tpu.memory_space<vmem>>, vector<8x8xf32>
    %cst_18 = arith.constant dense<0.000000e+00> : vector<8x128xf32>
    %50 = tpu.matmul %49, %0, %cst_18 {dimension_numbers = #tpu.dot_dimension_numbers<[1], [0], [0], [1], [0, 0, 1, 1], [], []>, precision = #tpu.contract_precision<fp32>} : vector<8x8xf32>, vector<8x128xf32>, vector<8x128xf32> -> vector<8x128xf32>
    %51 = arith.addf %48, %50 : vector<8x128xf32>
    %c0_19 = arith.constant 0 : index
    %c0_20 = arith.constant 0 : index
    %52 = vector.load %arg6[%c0_19, %c0_20] : memref<8x1xf32, #tpu.memory_space<vmem>>, vector<8x1xf32>
    %53 = vector.broadcast %52 : vector<8x1xf32> to vector<8x128xf32>
    %54 = arith.addf %51, %53 : vector<8x128xf32>
    %cst_21 = arith.constant 0.000000e+00 : f32
    %55 = vector.broadcast %cst_21 : f32 to vector<8x128xf32>
    %56 = arith.maximumf %54, %55 : vector<8x128xf32>
    %c0_22 = arith.constant 0 : index
    %c0_23 = arith.constant 0 : index
    %57 = vector.load %arg7[%c0_22, %c0_23] : memref<8x128xf32, #tpu.memory_space<vmem>>, vector<8x128xf32>
    tpu.vector_store %arg7[%c0_22, %c0_23], %56 {strides = array<i32>} : memref<8x128xf32, #tpu.memory_space<vmem>>, vector<8x128xf32>,
    return
  }
  func.func @transform_0(%arg0: i32) -> (i32, i32) {
    %c0_i32 = arith.constant 0 : i32
    %c0_i32_0 = arith.constant 0 : i32
    return %c0_i32, %arg0 : i32, i32
  }
  func.func @transform_1(%arg0: i32) -> (i32, i32) {
    %c0_i32 = arith.constant 0 : i32
    %c0_i32_0 = arith.constant 0 : i32
    %c0_i32_1 = arith.constant 0 : i32
    return %c0_i32, %c0_i32_0 : i32, i32
  }
  func.func @transform_2(%arg0: i32) -> (i32, i32) {
    %c0_i32 = arith.constant 0 : i32
    %c0_i32_0 = arith.constant 0 : i32
    %c0_i32_1 = arith.constant 0 : i32
    return %c0_i32, %c0_i32_0 : i32, i32
  }
  func.func @transform_3(%arg0: i32) -> (i32, i32) {
    %c0_i32 = arith.constant 0 : i32
    %c0_i32_0 = arith.constant 0 : i32
    %c0_i32_1 = arith.constant 0 : i32
    return %c0_i32, %c0_i32_0 : i32, i32
  }
  func.func @transform_4(%arg0: i32) -> (i32, i32) {
    %c0_i32 = arith.constant 0 : i32
    %c0_i32_0 = arith.constant 0 : i32
    %c0_i32_1 = arith.constant 0 : i32
    return %c0_i32, %c0_i32_0 : i32, i32
  }
  func.func @transform_5(%arg0: i32) -> (i32, i32) {
    %c0_i32 = arith.constant 0 : i32
    %c0_i32_0 = arith.constant 0 : i32
    %c0_i32_1 = arith.constant 0 : i32
    return %c0_i32, %c0_i32_0 : i32, i32
  }
  func.func @transform_6(%arg0: i32) -> (i32, i32) {
    %c0_i32 = arith.constant 0 : i32
    %c0_i32_0 = arith.constant 0 : i32
    return %c0_i32, %arg0 : i32, i32
  }
}

</mosaic_0001>

<bundles_post_ra>
// kernel: resblock1d_pallas.1
= control target key start
LH: loop header
LB: loop body
LE: loop exit
PB: predicated region body
PF: predicated region fallthrough
CT: control target
= control target key end

     0   :  { %v1687_v1 = vmov 0.0   ;;  %vm1688_vm0 = vmmov 0   ;;  %s1689_s23 = smov 127   ;;  %s1690_s24 = smov 1   ;;  %v1691_v2 = vmov 0   ;;  %v24_v4 = vlaneseq  ;;  %s1877_s0 = inlined_call_operand.vmem [shape: f32[8,128], index: 0, kind: input, shape index: {}]   ;;  %s1878_s2 = inlined_call_operand.vmem [shape: f32[8,1], index: 2, kind: input, shape index: {}]   ;;  %s1879_s1 = inlined_call_operand.vmem [shape: f32[8,24], index: 1, kind: input, shape index: {}]   ;;  %s1880_s4 = inlined_call_operand.vmem [shape: f32[8,8], index: 4, kind: input, shape index: {}]   ;;  %s1881_s5 = inlined_call_operand.vmem [shape: f32[8,1], index: 5, kind: input, shape index: {}]   ;;  %s1882_s3 = inlined_call_operand.vmem [shape: f32[8,24], index: 3, kind: input, shape index: {}]   ;;  %s1883_s6 = inlined_call_operand.vmem [shape: f32[8,128], index: 6, kind: output, shape index: {}]  }
   0x1   :  { %v23_v0 = vld [vmem:[%s1877_s0] sm:$0xff]  ;;  %1542 = vmatprep.subr.mxu0 %v1687_v1  ;;  %1548 = vmatprep.mubr.msk.f32.mxu0 %vm1688_vm0, %v1687_v1  ;;  %vm57_vm1 = vcmask 195584   ;;  %vm542_vm4 = vcmask 64512  }
   0x2   :  { %48 = vrot.lane.b32.xlu0 %v23_v0, %s1689_s23  ;;  %1551 = vmatprep.subr.mxu1 %v1687_v1  ;;  %v51_v3 = vld [vmem:[%s1878_s2] sm:$0xff]  ;;  %v25_v6 = vand.u32 127, %v24_v4  ;;  %v1748_v11 = vand.u32 4294901760, %v23_v0 }
   0x3   :  { %1557 = vmatprep.mubr.msk.f32.mxu1 %vm1688_vm0, %v1687_v1  ;;  %1685 = vset.pattern.permute.xlu1 %v1691_v2  ;;  %v44_v5 = vld [vmem:[%s1879_s1] sm:$0xff] }
   0x4   :  { %1686 = vset.pattern.permute.xlu0 %v1691_v2  ;;  %54 = vperm.xlu1 %1685, %v51_v3   ;;  %v59_v7 = vsel %vm57_vm1, %v44_v5, 0  ;;  %v30_v9 = vand.u32 15, %v25_v6  ;;  %v1754_v14 = vsub.f32 %v23_v0, %v1748_v11  ;;  %v541_v35 = vld [vmem:[%s1880_s4] sm:$0xff] }
   0x5   :  { %v1745_v8 = vand.u32 4294901760, %v59_v7  ;;  %v544_v36 = vsel %vm542_vm4, %v541_v35, 0  ;;  %v1467_v62 = vld [vmem:[%s1881_s5] sm:$0xff] }
   0x6   :  { %45 = vrot.lane.b32.xlu0 %v23_v0, %s1690_s24  ;;  %vm41_vm2 = vcmp.ne.s32.totalorder %v30_v9, 15  ;;  %vm38_vm3 = vcmp.ne.s32.totalorder %v30_v9, 0  ;;  %v1761_v20 = vand.u32 4294901760, %v1754_v14  ;;  %v612_v37 = vand.u32 4294901760, %v544_v36 }
   0x7   :  { %v130_v10 = vsub.f32 %v59_v7, %v1745_v8  ;;  %v1751_v12 = vsel %vm41_vm2, 1.0, %v1687_v1  ;;  %v1758_v17 = vsel %vm38_vm3, 1.0, %v1687_v1 }
   0x8   :  { %v176_v27 = vsub.f32 %v1754_v14, %v1761_v20  ;;  %v613_v38 = vsub.f32 %v544_v36, %v612_v37 }
   0x9   :  { %v131_v13 = vand.u32 4294901760, %v130_v10 }
   0xa   :  { %v177_v31 = vand.u32 4294901760, %v176_v27  ;;  %v614_v39 = vand.u32 4294901760, %v613_v38 }
   0xb   :  { %v132_v18 = vsub.f32 %v130_v10, %v131_v13 }
   0xc   :  { %v615_v40 = vsub.f32 %v613_v38, %v614_v39 }
   0xd   :  { %v133_v24 = vand.u32 4294901760, %v132_v18 }
   0xe   :  { %v616_v41 = vand.u32 4294901760, %v615_v40 }
  0x74   :  { %v49_v15 = vpop.permute.xlu0 %48 }
  0x75   :  { %v50_v16 = vmul.f32 %v1751_v12, %v49_v15 }
  0x77   :  { %v88_v19 = vand.u32 4294901760, %v50_v16 }
  0x78   :  { %v46_v21 = vpop.permute.xlu0 %45 }
  0x79   :  { %v167_v22 = vsub.f32 %v50_v16, %v88_v19  ;;  %v47_v23 = vmul.f32 %v1758_v17, %v46_v21  ;;  %1543 = vmatpush3.msra.mxu0 %v88_v19 }
  0x7a   :  { %1544 = vmatprep.subr.mxu0 %v1687_v1 }
  0x7b   :  { %v94_v25 = vand.u32 4294901760, %v47_v23  ;;  %1545 = vmatpush3.msra.mxu0 %v1748_v11  ;;  %v168_v26 = vand.u32 4294901760, %v167_v22 }
  0x7c   :  { %1546 = vmatprep.subr.mxu0 %v1687_v1 }
  0x7d   :  { %v181_v28 = vsub.f32 %v47_v23, %v94_v25  ;;  %1547 = vmatpush3.msra.mxu0 %v94_v25  ;;  %v169_v29 = vsub.f32 %v167_v22, %v168_v26 }
  0x7e   :  { %1560 = vmatprep.subr.mxu0 %v1687_v1  ;;  %1549 = vmatmul.mubr.f32.vlgmr.msra.gmra.mxu0 %v133_v24 }
  0x7f   :  { %1561 = vmatpush3.msra.mxu0 %v167_v22  ;;  %v170_v30 = vand.u32 4294901760, %v169_v29  ;;  %1566 = vmatprep.mubr.msk.f32.mxu0 %vm1688_vm0, %v1687_v1  ;;  %v182_v32 = vand.u32 4294901760, %v181_v28  ;;  %v55_v43 = vpop.permute.xlu1 %54 }
  0x80   :  { %1562 = vmatprep.subr.mxu0 %v1687_v1 }
  0x81   :  { %1552 = vmatpush3.msra.mxu1 %v170_v30  ;;  %1563 = vmatpush3.msra.mxu0 %v1754_v14  ;;  %v183_v33 = vsub.f32 %v181_v28, %v182_v32 }
  0x82   :  { %1553 = vmatprep.subr.mxu1 %v1687_v1  ;;  %1564 = vmatprep.subr.mxu0 %v1687_v1 }
  0x83   :  { %1554 = vmatpush3.msra.mxu1 %v177_v31  ;;  %1565 = vmatpush3.msra.mxu0 %v181_v28  ;;  %v184_v34 = vand.u32 4294901760, %v183_v33 }
  0x84   :  { %1555 = vmatprep.subr.mxu1 %v1687_v1  ;;  %1578 = vmatprep.subr.mxu0 %v1687_v1 }
  0x85   :  { %1556 = vmatpush3.msra.mxu1 %v184_v34  ;;  %1567 = vmatmul.mubr.f32.vlgmr.msra.gmra.mxu0 %v130_v10 }
  0x86   :  { %1579 = vmatpush3.msra.mxu0 %v168_v26  ;;  %1558 = vmatmul.mubr.f32.vlgmr.msra.gmra.mxu1 %v1745_v8 }
  0x87   :  { %1569 = vmatprep.subr.mxu1 %v1687_v1  ;;  %1580 = vmatprep.subr.mxu0 %v1687_v1 }
  0x88   :  { %1570 = vmatpush3.msra.mxu1 %v88_v19  ;;  %1581 = vmatpush3.msra.mxu0 %v1761_v20 }
  0x89   :  { %1571 = vmatprep.subr.mxu1 %v1687_v1  ;;  %1582 = vmatprep.subr.mxu0 %v1687_v1 }
  0x8a   :  { %1572 = vmatpush3.msra.mxu1 %v1748_v11  ;;  %1583 = vmatpush3.msra.mxu0 %v182_v32 }
  0x8b   :  { %1573 = vmatprep.subr.mxu1 %v1687_v1  ;;  %1575 = vmatprep.mubr.msk.f32.mxu1 %vm1688_vm0, %v1687_v1 }
  0x8c   :  { %1574 = vmatpush3.msra.mxu1 %v94_v25  ;;  %1584 = vmatprep.mubr.msk.f32.mxu0 %vm1688_vm0, %v1687_v1 }
  0x8d   :  { %1576 = vmatmul.mubr.f32.vlgmr.msra.gmra.mxu1 %v131_v13  ;;  %1587 = vmatprep.subr.mxu1 %v1687_v1 }
  0x8e   :  { %1588 = vmatpush3.msra.mxu1 %v88_v19  ;;  %1585 = vmatmul.mubr.f32.vlgmr.msra.gmra.mxu0 %v1745_v8  ;;  %v534_v19 = vld [vmem:[%s1882_s3] sm:$0xff] }
  0x8f   :  { %1589 = vmatprep.subr.mxu1 %v1687_v1  ;;  %1593 = vmatprep.mubr.msk.f32.mxu1 %vm1688_vm0, %v1687_v1 }
  0x90   :  { %1590 = vmatpush3.msra.mxu1 %v1748_v11  ;;  %1596 = vmatprep.subr.mxu0 %v1687_v1 }
  0x91   :  { %1591 = vmatprep.subr.mxu1 %v1687_v1  ;;  %1597 = vmatpush3.msra.mxu0 %v1748_v11 }
  0x92   :  { %1592 = vmatpush3.msra.mxu1 %v94_v25  ;;  %1598 = vmatprep.mubr.msk.f32.mxu0 %vm1688_vm0, %v1687_v1 }
  0x93   :  { %1594 = vmatmul.mubr.f32.vlgmr.msra.gmra.mxu1 %v1745_v8  ;;  %1606 = vmatprep.subr.mxu0 %v1687_v1 }
  0x94   :  { %1601 = vmatprep.subr.mxu1 %v1687_v1  ;;  %1603 = vmatprep.mubr.msk.f32.mxu1 %vm1688_vm0, %v1687_v1 }
  0x95   :  { %1602 = vmatpush3.msra.mxu1 %v177_v31  ;;  %1599 = vmatmul.mubr.f32.vlgmr.msra.gmra.mxu0 %v616_v41 }
  0x96   :  { %1611 = vmatprep.subr.mxu1 %v1687_v1  ;;  %1607 = vmatpush3.msra.mxu0 %v1754_v14 }
  0x97   :  { %1604 = vmatmul.mubr.f32.vlgmr.msra.gmra.mxu1 %v612_v37  ;;  %1608 = vmatprep.mubr.msk.f32.mxu0 %vm1688_vm0, %v1687_v1 }
  0x98   :  { %1612 = vmatpush3.msra.mxu1 %v1748_v11  ;;  %1613 = vmatprep.mubr.msk.f32.mxu1 %vm1688_vm0, %v1687_v1 }
  0x99   :  { %1621 = vmatprep.subr.mxu1 %v1687_v1  ;;  %1616 = vmatprep.subr.mxu0 %v1687_v1 }
  0x9a   :  { %1609 = vmatmul.mubr.f32.vlgmr.msra.gmra.mxu0 %v613_v38 }
  0x9b   :  { %1614 = vmatmul.mubr.f32.vlgmr.msra.gmra.mxu1 %v614_v39  ;;  %1617 = vmatpush3.msra.mxu0 %v1761_v20  ;;  %v993_v20 = vsel %vm57_vm1, %v534_v19, 0 }
  0x9c   :  { %1622 = vmatpush3.msra.mxu1 %v1748_v11  ;;  %1623 = vmatprep.mubr.msk.f32.mxu1 %vm1688_vm0, %v1687_v1  ;;  %v1841_v21 = vand.u32 4294901760, %v993_v20 }
  0x9d   :  { %1635 = vmatprep.subr.mxu1 %v1687_v1  ;;  %1618 = vmatprep.mubr.msk.f32.mxu0 %vm1688_vm0, %v1687_v1 }
  0x9e   :  { %1626 = vmatprep.subr.mxu0 %v1687_v1  ;;  %1619 = vmatmul.mubr.f32.vlgmr.msra.gmra.mxu0 %v612_v37  ;;  %v1064_v22 = vsub.f32 %v993_v20, %v1841_v21 }
  0x9f   :  { %1624 = vmatmul.mubr.f32.vlgmr.msra.gmra.mxu1 %v612_v37  ;;  %1632 = vmatprep.mubr.msk.f32.mxu0 %vm1688_vm0, %v1687_v1 }
  0xa0   :  { %1641 = vmatprep.mubr.msk.f32.mxu1 %vm1688_vm0, %v1687_v1  ;;  %v1065_v24 = vand.u32 4294901760, %v1064_v22 }
  0xa2   :  { %v1066_v30 = vsub.f32 %v1064_v22, %v1065_v24 }
  0xa4   :  { %v1067_v36 = vand.u32 4294901760, %v1066_v30 }
 0x13e   :  { %v135_v42 = vpop.f32.mrf.mxu0 }
 0x13f   :  { %v136_v45 = vadd.f32 %v135_v42, %v55_v43 }
 0x140   :  { %v1550_v44 = vpop.f32.mrf.mxu0 }
 0x145   :  { %v299_v46 = vpop.f32.mrf.mxu0 }
 0x146   :  { %v221_v47 = vpop.f32.mrf.mxu1 }
 0x147   :  { %v222_v48 = vadd.f32 %v221_v47, %v136_v45  ;;  %v1568_v49 = vpop.f32.mrf.mxu0 }
 0x148   :  { %v1559_v50 = vpop.f32.mrf.mxu1 }
 0x149   :  { %v300_v51 = vadd.f32 %v299_v46, %v222_v48 }
 0x14d   :  { %v375_v52 = vpop.f32.mrf.mxu1 }
 0x14e   :  { %v376_v53 = vadd.f32 %v375_v52, %v300_v51  ;;  %v455_v54 = vpop.f32.mrf.mxu0 }
 0x14f   :  { %v1577_v55 = vpop.f32.mrf.mxu1 }
 0x150   :  { %v1586_v56 = vpop.f32.mrf.mxu0  ;;  %v456_v57 = vadd.f32 %v455_v54, %v376_v53 }
 0x153   :  { %v529_v58 = vpop.f32.mrf.mxu1 }
 0x154   :  { %v530_v59 = vadd.f32 %v529_v58, %v456_v57 }
 0x155   :  { %v1595_v60 = vpop.f32.mrf.mxu1  ;;  %v618_v4 = vpop.f32.mrf.mxu0 }
 0x156   :  { %v533_v61 = vmax.f32 %v530_v59, 0.0 }
 0x157   :  { %v694_v63 = vpop.f32.mrf.mxu1  ;;  %v1600_v7 = vpop.f32.mrf.mxu0 }
 0x158   :  { %535 = vrot.lane.b32.xlu0 %v533_v61, %s1690_s24  ;;  %538 = vrot.lane.b32.xlu1 %v533_v61, %s1689_s23  ;;  %v695_v6 = vadd.f32 %v694_v63, %v618_v4  ;;  %v1025_v23 = vand.u32 4294901760, %v533_v61 }
 0x159   :  { %v1605_v0 = vpop.f32.mrf.mxu1 }
 0x15a   :  { %v768_v9 = vpop.f32.mrf.mxu0  ;;  %v1108_v29 = vsub.f32 %v533_v61, %v1025_v23 }
 0x15b   :  { %v842_v2 = vpop.f32.mrf.mxu1  ;;  %v769_v10 = vadd.f32 %v768_v9, %v695_v6 }
 0x15c   :  { %1470 = vperm.xlu1 %1685, %v1467_v62   ;;  %v1610_v11 = vpop.f32.mrf.mxu0  ;;  %v1109_v35 = vand.u32 4294901760, %v1108_v29 }
 0x15d   :  { %v1615_v3 = vpop.f32.mrf.mxu1  ;;  %v843_v13 = vadd.f32 %v842_v2, %v769_v10 }
 0x15e   :  { %v916_v14 = vpop.f32.mrf.mxu0 }
 0x15f   :  { %v988_v5 = vpop.f32.mrf.mxu1  ;;  %v917_v15 = vadd.f32 %v916_v14, %v843_v13 }
 0x160   :  { %v1620_v16 = vpop.f32.mrf.mxu0 }
 0x161   :  { %v1625_v8 = vpop.f32.mrf.mxu1  ;;  %v1835_v18 = vadd.f32 %v988_v5, %v917_v15 }
 0x1ca   :  { %v536_v25 = vpop.permute.xlu0 %535  ;;  %v539_v26 = vpop.permute.xlu1 %538 }
 0x1cb   :  { %v537_v27 = vmul.f32 %v1758_v17, %v536_v25  ;;  %v540_v28 = vmul.f32 %v1751_v12, %v539_v26  ;;  %v1110_v17 = vsub.f32 %v1108_v29, %v1109_v35 }
 0x1cd   :  { %v1028_v31 = vand.u32 4294901760, %v537_v27  ;;  %v1022_v32 = vand.u32 4294901760, %v540_v28  ;;  %v1111_v41 = vand.u32 4294901760, %v1110_v17 }
 0x1cf   :  { %v1115_v33 = vsub.f32 %v537_v27, %v1028_v31  ;;  %v1101_v34 = vsub.f32 %v540_v28, %v1022_v32  ;;  %1627 = vmatpush3.msra.mxu0 %v1022_v32 }
 0x1d0   :  { %1628 = vmatprep.subr.mxu0 %v1687_v1 }
 0x1d1   :  { %v1116_v37 = vand.u32 4294901760, %v1115_v33  ;;  %v1102_v38 = vand.u32 4294901760, %v1101_v34  ;;  %1629 = vmatpush3.msra.mxu0 %v1025_v23 }
 0x1d2   :  { %1630 = vmatprep.subr.mxu0 %v1687_v1 }
 0x1d3   :  { %v1103_v39 = vsub.f32 %v1101_v34, %v1102_v38  ;;  %1631 = vmatpush3.msra.mxu0 %v1028_v31  ;;  %v1117_v12 = vsub.f32 %v1115_v33, %v1116_v37 }
 0x1d4   :  { %1644 = vmatprep.subr.mxu0 %v1687_v1  ;;  %1633 = vmatmul.mubr.f32.vlgmr.msra.gmra.mxu0 %v1067_v36 }
 0x1d5   :  { %1645 = vmatpush3.msra.mxu0 %v1101_v34  ;;  %v1104_v40 = vand.u32 4294901760, %v1103_v39  ;;  %1650 = vmatprep.mubr.msk.f32.mxu0 %vm1688_vm0, %v1687_v1  ;;  %v1118_v42 = vand.u32 4294901760, %v1117_v12 }
 0x1d6   :  { %1646 = vmatprep.subr.mxu0 %v1687_v1 }
 0x1d7   :  { %1636 = vmatpush3.msra.mxu1 %v1104_v40  ;;  %1647 = vmatpush3.msra.mxu0 %v1108_v29  ;;  %v1471_v59 = vpop.permute.xlu1 %1470 }
 0x1d8   :  { %1637 = vmatprep.subr.mxu1 %v1687_v1  ;;  %1648 = vmatprep.subr.mxu0 %v1687_v1 }
 0x1d9   :  { %1638 = vmatpush3.msra.mxu1 %v1111_v41  ;;  %1649 = vmatpush3.msra.mxu0 %v1115_v33 }
 0x1da   :  { %1639 = vmatprep.subr.mxu1 %v1687_v1  ;;  %1662 = vmatprep.subr.mxu0 %v1687_v1 }
 0x1db   :  { %1640 = vmatpush3.msra.mxu1 %v1118_v42  ;;  %1651 = vmatmul.mubr.f32.vlgmr.msra.gmra.mxu0 %v1064_v22 }
 0x1dc   :  { %1663 = vmatpush3.msra.mxu0 %v1102_v38  ;;  %1642 = vmatmul.mubr.f32.vlgmr.msra.gmra.mxu1 %v1841_v21 }
 0x1dd   :  { %1653 = vmatprep.subr.mxu1 %v1687_v1  ;;  %1664 = vmatprep.subr.mxu0 %v1687_v1 }
 0x1de   :  { %1654 = vmatpush3.msra.mxu1 %v1022_v32  ;;  %1665 = vmatpush3.msra.mxu0 %v1109_v35 }
 0x1df   :  { %1655 = vmatprep.subr.mxu1 %v1687_v1  ;;  %1666 = vmatprep.subr.mxu0 %v1687_v1 }
 0x1e0   :  { %1656 = vmatpush3.msra.mxu1 %v1025_v23  ;;  %1667 = vmatpush3.msra.mxu0 %v1116_v37 }
 0x1e1   :  { %1657 = vmatprep.subr.mxu1 %v1687_v1  ;;  %1659 = vmatprep.mubr.msk.f32.mxu1 %vm1688_vm0, %v1687_v1 }
 0x1e2   :  { %1658 = vmatpush3.msra.mxu1 %v1028_v31  ;;  %1668 = vmatprep.mubr.msk.f32.mxu0 %vm1688_vm0, %v1687_v1 }
 0x1e3   :  { %1660 = vmatmul.mubr.f32.vlgmr.msra.gmra.mxu1 %v1065_v24  ;;  %1671 = vmatprep.subr.mxu1 %v1687_v1 }
 0x1e4   :  { %1672 = vmatpush3.msra.mxu1 %v1022_v32  ;;  %1669 = vmatmul.mubr.f32.vlgmr.msra.gmra.mxu0 %v1841_v21 }
 0x1e5   :  { %1673 = vmatprep.subr.mxu1 %v1687_v1  ;;  %1677 = vmatprep.mubr.msk.f32.mxu1 %vm1688_vm0, %v1687_v1 }
 0x1e6   :  { %1674 = vmatpush3.msra.mxu1 %v1025_v23 }
 0x1e7   :  { %1675 = vmatprep.subr.mxu1 %v1687_v1 }
 0x1e8   :  { %1676 = vmatpush3.msra.mxu1 %v1028_v31 }
 0x1e9   :  { %1678 = vmatmul.mubr.f32.vlgmr.msra.gmra.mxu1 %v1841_v21 }
 0x294   :  { %v1069_v43 = vpop.f32.mrf.mxu0 }
 0x295   :  { %v1070_v46 = vadd.f32 %v1069_v43, %v1835_v18 }
 0x296   :  { %v1634_v44 = vpop.f32.mrf.mxu0 }
 0x29b   :  { %v1233_v45 = vpop.f32.mrf.mxu0 }
 0x29c   :  { %v1155_v47 = vpop.f32.mrf.mxu1 }
 0x29d   :  { %v1652_v48 = vpop.f32.mrf.mxu0  ;;  %v1156_v49 = vadd.f32 %v1155_v47, %v1070_v46 }
 0x29e   :  { %v1643_v50 = vpop.f32.mrf.mxu1 }
 0x29f   :  { %v1234_v51 = vadd.f32 %v1233_v45, %v1156_v49 }
 0x2a3   :  { %v1309_v52 = vpop.f32.mrf.mxu1 }
 0x2a4   :  { %v1310_v53 = vadd.f32 %v1309_v52, %v1234_v51  ;;  %v1389_v54 = vpop.f32.mrf.mxu0 }
 0x2a5   :  { %v1661_v55 = vpop.f32.mrf.mxu1 }
 0x2a6   :  { %v1670_v56 = vpop.f32.mrf.mxu0  ;;  %v1390_v57 = vadd.f32 %v1389_v54, %v1310_v53 }
 0x2a9   :  { %v1463_v1 = vpop.f32.mrf.mxu1 }
 0x2aa   :  { %v1464_v58 = vadd.f32 %v1463_v1, %v1390_v57 }
 0x2ab   :  { %v1679_v60 = vpop.f32.mrf.mxu1 }
 0x2ac   :  { %v1473_v61 = vadd.f32 %v1471_v59, %v1464_v58 }
 0x2ae   :  { %v1474_v62 = vmax.f32 %v1473_v61, 0.0 }
 0x2b0   :  { %1475 = vst [vmem:[%s1883_s6] sm:$0xff] %v1474_v62 }

</bundles_post_ra>
